<compile_context>
chip_gen: v6e
topology: v6e:2x2x1
jax: 0.10.0
libtpu: 0.0.40
codegen_flags: <defaults>
</compile_context>

<pallas_src>
import jax
import jax.numpy as jnp
from jax.experimental import pallas as pl
from jax.experimental.pallas import tpu as pltpu


def _round_up(a: int, m: int) -> int:
    return ((a + m - 1) // m) * m


def _vmem_budget_bytes() -> int:
    """Generation-aware VMEM budget (never the full physical VMEM)."""
    cap = 64 * 1024 * 1024  # conservative fallback: v7x per-TensorCore physical
    try:
        cap = int(pltpu.get_tpu_info().vmem_capacity_bytes)
    except Exception:
        pass
    # 13/16 of physical (52 MiB on v7x), capped at 100 MiB on 128-MiB parts.
    return min(cap * 13 // 16, 100 * 1024 * 1024)


def _scale_linear_kernel(scale_ref, x_ref, wt_ref, b_ref, o_ref):
    # scale_ref: (1,1) f32 in SMEM
    # x_ref:  (TM, Kp)  compute dtype
    # wt_ref: (Kp, TN)  compute dtype (pre-transposed W)
    # b_ref:  (1,  TN)  f32
    # o_ref:  (TM, TN)  output dtype
    acc = jnp.dot(x_ref[...], wt_ref[...], preferred_element_type=jnp.float32)
    o_ref[...] = ((acc + b_ref[...]) * scale_ref[0, 0]).astype(o_ref.dtype)


class ScaleLinear:
    """Scale(nn.Linear(K, N), scale): y = (x @ W^T + b) * scale, one fused kernel.

    Weight prep (transpose, pad, dtype cast) happens once here, not per call.
    """

    def __init__(self, w, b, scale, *, compute_dtype=None, _force_n_tile=None):
        w = jnp.asarray(w)
        self.n_out, self.k_in = w.shape
        self.compute_dtype = (jnp.dtype(compute_dtype)
                              if compute_dtype is not None else jnp.dtype(w.dtype))
        bpe = self.compute_dtype.itemsize
        out_bpe = 4  # worst-case output element size for the fit check

        self.budget = _vmem_budget_bytes()
        # Bigger row tiles on 128-MiB VMEM parts (v5e/v6e), smaller on v7x.
        self.tm_default = 512 if self.budget >= 80 * 1024 * 1024 else 256

        k_pad = _round_up(self.k_in, 128)
        n128 = _round_up(self.n_out, 128)
        slack = 2 * 1024 * 1024  # Mosaic internal scratch / semaphore headroom

        # Path "resident": whole padded W lives in VMEM, fetched from HBM once.
        # (W is budgeted double-buffered even though its constant index map means
        #  only one fetch ever happens — see header note about pl.Buffered(1).)
        fit_resident = (2 * k_pad * n128 * bpe
                        + 2 * self.tm_default * k_pad * bpe      # x, double-buffered
                        + 2 * self.tm_default * n128 * out_bpe   # out, double-buffered
                        + 2 * n128 * 4 + slack)

        if _force_n_tile is not None:
            self.path = "stream_x"
            self.tn = min(_round_up(int(_force_n_tile), 128), n128)
            n_pad = _round_up(n128, self.tn)
        elif fit_resident <= self.budget:
            self.path = "resident"
            self.tn = n128
            n_pad = n128
        else:
            # Path "stream_x": tile the output/N dim; grid order (col, row) keeps
            # the W column slab resident across the inner row loop, so W is still
            # read from HBM exactly once and x is the streamed operand.
            self.path = "stream_x"
            tn = None
            for cand in (2048, 1024, 512, 256, 128):
                if cand > n128:
                    continue
                need = (2 * k_pad * cand * bpe
                        + 2 * self.tm_default * k_pad * bpe
                        + 2 * self.tm_default * cand * out_bpe
                        + 2 * cand * 4 + slack)
                if need <= self.budget:
                    tn = cand
                    break
            if tn is None:
                tn = 128
                # TODO(synk): for very large K the (tm, k_pad) x block alone can
                # overflow VMEM; the proper fix is a third (K) grid axis with an
                # f32 accumulator scratch. Here we shrink the row tile instead.
                while (2 * k_pad * tn * bpe + 2 * self.tm_default * k_pad * bpe
                       + 2 * self.tm_default * tn * out_bpe + slack) > self.budget \
                        and self.tm_default > 8:
                    self.tm_default //= 2
            self.tn = tn
            n_pad = _round_up(n128, tn)

        self.k_pad = k_pad
        self.n_pad = n_pad

        # One-time weight prep (hoisted out of every forward call):
        # transpose to [in, out] so the kernel never transposes, zero-pad to the
        # tiled shape, cast to the MXU feed dtype. Bias stays f32 (epilogue dtype).
        wt = jnp.pad(w.T, ((0, k_pad - self.k_in), (0, n_pad - self.n_out)))
        self.wt = wt.astype(self.compute_dtype)
        self.b2 = jnp.pad(jnp.asarray(b, jnp.float32).reshape(1, -1),
                          ((0, 0), (0, n_pad - self.n_out)))
        self.scale_arr = jnp.full((1, 1), scale, jnp.float32)

        self._fn = jax.jit(self._forward)

    # ------------------------------------------------------------------ #

    def _forward(self, x, wt, b2, scale_arr):
        orig_shape = x.shape
        rows = 1
        for d in orig_shape[:-1]:
            rows *= int(d)

        tm = min(self.tm_default, _round_up(rows, 8))
        tm = _round_up(tm, 8)
        rows_pad = _round_up(rows, tm)

        x2 = x.reshape(rows, self.k_in)
        x2 = jnp.pad(x2, ((0, rows_pad - rows), (0, self.k_pad - self.k_in)))
        x2 = x2.astype(self.compute_dtype)

        scale_spec = pl.BlockSpec(memory_space=pltpu.MemorySpace.SMEM)
        out_shape = jax.ShapeDtypeStruct((rows_pad, self.n_pad), x.dtype)

        if self.path == "resident":
            # Grid over row tiles only; W / bias have constant index maps, so they
            # are DMA'd into VMEM exactly once and reused by every row tile.
            grid = (rows_pad // tm,)
            in_specs = [
                scale_spec,
                pl.BlockSpec((tm, self.k_pad), lambda i: (i, 0)),
                pl.BlockSpec((self.k_pad, self.n_pad), lambda i: (0, 0)),
                pl.BlockSpec((1, self.n_pad), lambda i: (0, 0)),
            ]
            out_specs = pl.BlockSpec((tm, self.n_pad), lambda i: (i, 0))
            dims = ("parallel",)
        else:
            # Grid = (col, row): the W column slab's index depends only on the
            # outer axis j, so it stays resident across the inner row loop.
            grid = (self.n_pad // self.tn, rows_pad // tm)
            in_specs = [
                scale_spec,
                pl.BlockSpec((tm, self.k_pad), lambda j, i: (i, 0)),
                pl.BlockSpec((self.k_pad, self.tn), lambda j, i: (0, j)),
                pl.BlockSpec((1, self.tn), lambda j, i: (0, j)),
            ]
            out_specs = pl.BlockSpec((tm, self.tn), lambda j, i: (i, j))
            dims = ("parallel", "parallel")

        out = pl.pallas_call(
            _scale_linear_kernel,
            out_shape=out_shape,
            grid_spec=pltpu.PrefetchScalarGridSpec(
                num_scalar_prefetch=0,
                grid=grid,
                in_specs=in_specs,
                out_specs=out_specs,
            ),
            compiler_params=pltpu.CompilerParams(
                dimension_semantics=dims,
                vmem_limit_bytes=int(self.budget),
            ),
        )(scale_arr, x2, wt, b2)

        out = out[:rows, :self.n_out]
        return out.reshape(orig_shape[:-1] + (self.n_out,))

    def __call__(self, x):
        return self._fn(x, self.wt, self.b2, self.scale_arr)


def scale_linear_ref(x, w, b, scale):
    return ((x @ w.T + b) * scale).astype(x.dtype)


if __name__ == "__main__":
    # TODO(synk): `Scale.fn` is an arbitrary callable in PyTorch; it is
    # instantiated here as nn.Linear(D, D) so fn + scale fuse into one kernel.
    scale = 0.5
    B, S, D = 2, 8, 32

    k_x, k_w, k_b = jax.random.split(jax.random.PRNGKey(0), 3)
    x = jax.random.normal(k_x, (B, S, D), dtype=jnp.float32)
    bound = 1.0 / (D ** 0.5)
    w = jax.random.uniform(k_w, (D, D), minval=-bound, maxval=bound, dtype=jnp.float32)
    b = jax.random.uniform(k_b, (D,), minval=-bound, maxval=bound, dtype=jnp.float32)

    # 1) Default (f32 MXU feed, W fully VMEM-resident path).
    mod = ScaleLinear(w, b, scale)
    out = mod(x)
    jax.block_until_ready(out)
    assert out.shape == (B, S, D)
    assert jnp.allclose(out, scale_linear_ref(x, w, b, scale), atol=1e-5, rtol=1e-5)

    # 2) bf16 MXU feed (perf path), f32 accumulation — looser tolerance.
    mod_bf16 = ScaleLinear(w, b, scale, compute_dtype=jnp.bfloat16)
    out_bf16 = mod_bf16(x)
    jax.block_until_ready(out_bf16)
    assert jnp.allclose(out_bf16, scale_linear_ref(x, w, b, scale), atol=5e-2, rtol=5e-2)

    # 3) Exercise the N-tiled streaming path (grid reorder) and non-128 dims.
    D2 = 160
    k_x2, k_w2, k_b2 = jax.random.split(jax.random.PRNGKey(1), 3)
    x2 = jax.random.normal(k_x2, (3, 5, D2), dtype=jnp.float32)
    bound2 = 1.0 / (D2 ** 0.5)
    w2 = jax.random.uniform(k_w2, (D2, D2), minval=-bound2, maxval=bound2, dtype=jnp.float32)
    b2 = jax.random.uniform(k_b2, (D2,), minval=-bound2, maxval=bound2, dtype=jnp.float32)
    mod2 = ScaleLinear(w2, b2, 1.7, _force_n_tile=128)
    out2 = mod2(x2)
    jax.block_until_ready(out2)
    assert out2.shape == (3, 5, D2)
    assert jnp.allclose(out2, scale_linear_ref(x2, w2, b2, 1.7), atol=1e-4, rtol=1e-4)

    print("KERNEL_OK")
</pallas_src>

<mosaic_0001>
module attributes {stable_mosaic.version = 11 : i64} {
  func.func @_scale_linear_kernel(%arg0: i32, %arg1: memref<1x1xf32, #tpu.memory_space<smem>>, %arg2: memref<16x128xf32, #tpu.memory_space<vmem>>, %arg3: memref<128x128xf32, #tpu.memory_space<vmem>>, %arg4: memref<1x128xf32, #tpu.memory_space<vmem>>, %arg5: memref<16x128xf32, #tpu.memory_space<vmem>>) attributes {dimension_semantics = [#tpu.dimension_semantics<parallel>], iteration_bounds = array<i64: 1>, scalar_prefetch = 0 : i64, scratch_operands = 0 : i64, tpu.core_type = #tpu.core_type<tc>, window_params = [{transform_indices = @transform_0, window_bounds = array<i64: 1, 1>}, {transform_indices = @transform_1, window_bounds = array<i64: 16, 128>}, {pipeline_mode = #tpu.pipeline_mode<synchronous>, transform_indices = @transform_2, window_bounds = array<i64: 128, 128>}, {pipeline_mode = #tpu.pipeline_mode<synchronous>, transform_indices = @transform_3, window_bounds = array<i64: 1, 128>}, {transform_indices = @transform_4, window_bounds = array<i64: 16, 128>}]} {
    %c0 = arith.constant 0 : index
    %c0_0 = arith.constant 0 : index
    %0 = vector.load %arg2[%c0, %c0_0] : memref<16x128xf32, #tpu.memory_space<vmem>>, vector<16x128xf32>
    %c0_1 = arith.constant 0 : index
    %c0_2 = arith.constant 0 : index
    %1 = vector.load %arg3[%c0_1, %c0_2] : memref<128x128xf32, #tpu.memory_space<vmem>>, vector<128x128xf32>
    %cst = arith.constant dense<0.000000e+00> : vector<16x128xf32>
    %2 = tpu.matmul %0, %1, %cst {dimension_numbers = #tpu.dot_dimension_numbers<[1], [0], [0], [1], [0, 0, 1, 1], [], []>} : vector<16x128xf32>, vector<128x128xf32>, vector<16x128xf32> -> vector<16x128xf32>
    %c0_3 = arith.constant 0 : index
    %c0_4 = arith.constant 0 : index
    %3 = vector.load %arg4[%c0_3, %c0_4] : memref<1x128xf32, #tpu.memory_space<vmem>>, vector<1x128xf32>
    %4 = vector.broadcast %3 : vector<1x128xf32> to vector<16x128xf32>
    %5 = arith.addf %2, %4 : vector<16x128xf32>
    %c0_5 = arith.constant 0 : index
    %c0_6 = arith.constant 0 : index
    %6 = memref.load %arg1[%c0_5, %c0_6] : memref<1x1xf32, #tpu.memory_space<smem>>
    %7 = vector.broadcast %6 : f32 to vector<16x128xf32>
    %8 = arith.mulf %5, %7 : vector<16x128xf32>
    %c0_7 = arith.constant 0 : index
    %c0_8 = arith.constant 0 : index
    %9 = vector.load %arg5[%c0_7, %c0_8] : memref<16x128xf32, #tpu.memory_space<vmem>>, vector<16x128xf32>
    tpu.vector_store %arg5[%c0_7, %c0_8], %8 {strides = array<i32>} : memref<16x128xf32, #tpu.memory_space<vmem>>, vector<16x128xf32>,
    return
  }
  func.func @transform_0(%arg0: i32) -> (i32, i32) {
    %c0_i32 = arith.constant 0 : i32
    %c0_i32_0 = arith.constant 0 : i32
    %c0_i32_1 = arith.constant 0 : i32
    return %c0_i32, %c0_i32_0 : i32, i32
  }
  func.func @transform_1(%arg0: i32) -> (i32, i32) {
    %c0_i32 = arith.constant 0 : i32
    %c0_i32_0 = arith.constant 0 : i32
    return %arg0, %c0_i32 : i32, i32
  }
  func.func @transform_2(%arg0: i32) -> (i32, i32) {
    %c0_i32 = arith.constant 0 : i32
    %c0_i32_0 = arith.constant 0 : i32
    %c0_i32_1 = arith.constant 0 : i32
    return %c0_i32, %c0_i32_0 : i32, i32
  }
  func.func @transform_3(%arg0: i32) -> (i32, i32) {
    %c0_i32 = arith.constant 0 : i32
    %c0_i32_0 = arith.constant 0 : i32
    %c0_i32_1 = arith.constant 0 : i32
    return %c0_i32, %c0_i32_0 : i32, i32
  }
  func.func @transform_4(%arg0: i32) -> (i32, i32) {
    %c0_i32 = arith.constant 0 : i32
    %c0_i32_0 = arith.constant 0 : i32
    return %arg0, %c0_i32 : i32, i32
  }
}

</mosaic_0001>

<bundles_post_ra>
// kernel: _forward.1
= control target key start
LH: loop header
LB: loop body
LE: loop exit
PB: predicated region body
PF: predicated region fallthrough
CT: control target
= control target key end

     0   :  { %10 = vsyncpa [#allocation4], 0  ;;  %s222_s15 = smov [#allocation3]   ;;  %s271_s0 = inlined_call_operand.<no memory space> [shape: f32[1,1], index: 0, kind: input, shape index: {}]   ;;  %s272_s1 = inlined_call_operand.vmem [shape: f32[16,128], index: 1, kind: input, shape index: {}]   ;;  %s273_s2 = inlined_call_operand.hbm [shape: f32[128,128], index: 2, kind: input, shape index: {}]   ;;  %s274_s3 = inlined_call_operand.vmem [shape: f32[1,128], index: 3, kind: input, shape index: {}]   ;;  %s275_s4 = inlined_call_operand.vmem [shape: f32[16,128], index: 4, kind: output, shape index: {}]  }
   0x1   :  { %s20_s16 = sshll.u32 %s222_s15, 4  ;;  %s21_s16 = int_to_ptr.vmem [resolvable:$true] %s20_s16 }
   0x2   :  { %s208_s17 = scalar_lea.vmem %s21_s16, 2048  ;;  %p213_p1 = scmp.lt.s32.totalorder %s21_s16, %s21_s16 }
   0x3   :  { %p209_p0 = scmp.ne.s32.totalorder %s21_s16, %s208_s17  ;;  %p214_p2 = scmp.lt.s32.totalorder %s208_s17, %s208_s17 }
   0x5   :  { %p215_p3 = por %p214_p2, %p213_p1 }
   0x7   :  { %p216_p4 = pnand %p215_p3, %p209_p0 }
   0x9   :  { %219 = shalt.err (!%p216_p4)
}
   0xa   :  { %s223_s18 = smov 128   ;;  %s224_s19 = smov 8  }
   0xb   :  { %26 = dma.hbm_to_vmem [thread:$0]  %s273_s2, 2048, %s21_s16, [#allocation4], %s223_s18, %s223_s18, %s224_s19  }
   0xc   :  { %220 = dma.done.wait [#allocation4], 2048  }
   0xd   :  { %221 = vsyncadd [#allocation4], 4294965248  ;;  %v49_v0 = vld [vmem:[#allocation3 + $0x78] sm:$0xff]  ;;  %v48_v1 = vld [vmem:[#allocation3 + $0x70] sm:$0xff]  ;;  %v133_v20 = vstv %s271_s0 }
   0xe   :  { %162 = vmatprep.subr.mxu0 %v49_v0  ;;  %v47_v2 = vld [vmem:[#allocation3 + $0x68] sm:$0xff]  ;;  %v46_v3 = vld [vmem:[#allocation3 + $0x60] sm:$0xff]  ;;  %v45_v5 = vld [vmem:[#allocation3 + $0x58] sm:$0xff] }
   0xf   :  { %163 = vmatpush3.msra.mxu0 %v49_v0  ;;  %v32_v4 = vld [vmem:[%s272_s1] sm:$0xff]  ;;  %v44_v6 = vld [vmem:[#allocation3 + $0x50] sm:$0xff]  ;;  %v43_v7 = vld [vmem:[#allocation3 + $0x48] sm:$0xff] }
  0x10   :  { %164 = vmatprep.subr.mxu0 %v48_v1  ;;  %194 = vmatprep.mubr.f32.mxu0 %v32_v4  ;;  %v42_v8 = vld [vmem:[#allocation3 + $0x40] sm:$0xff]  ;;  %v41_v9 = vld [vmem:[#allocation3 + $0x38] sm:$0xff]  ;;  %v40_v10 = vld [vmem:[#allocation3 + $0x30] sm:$0xff] }
  0x11   :  { %165 = vmatpush3.msra.mxu0 %v48_v1  ;;  %v39_v11 = vld [vmem:[#allocation3 + $0x28] sm:$0xff]  ;;  %v38_v12 = vld [vmem:[#allocation3 + $0x20] sm:$0xff]  ;;  %v37_v13 = vld [vmem:[#allocation3 + $0x18] sm:$0xff] }
  0x12   :  { %166 = vmatprep.subr.mxu0 %v47_v2  ;;  %v36_v14 = vld [vmem:[#allocation3 + $0x10] sm:$0xff]  ;;  %v35_v15 = vld [vmem:[#allocation3 + $0x8] sm:$0xff]  ;;  %v34_v16 = vld [vmem:[#allocation3] sm:$0xff] }
  0x13   :  { %167 = vmatpush3.msra.mxu0 %v47_v2  ;;  %v33_v17 = vld [vmem:[%s272_s1 + $0x8] sm:$0xff]  ;;  %v143_v18 = vld [vmem:[%s274_s3] ss:$0 sm:$0xff] }
  0x14   :  { %168 = vmatprep.subr.mxu0 %v46_v3 }
  0x15   :  { %169 = vmatpush3.msra.mxu0 %v46_v3 }
  0x16   :  { %170 = vmatprep.subr.mxu0 %v45_v5 }
  0x17   :  { %171 = vmatpush3.msra.mxu0 %v45_v5 }
  0x18   :  { %172 = vmatprep.subr.mxu0 %v44_v6 }
  0x19   :  { %173 = vmatpush3.msra.mxu0 %v44_v6 }
  0x1a   :  { %174 = vmatprep.subr.mxu0 %v43_v7 }
  0x1b   :  { %175 = vmatpush3.msra.mxu0 %v43_v7 }
  0x1c   :  { %176 = vmatprep.subr.mxu0 %v42_v8 }
  0x1d   :  { %177 = vmatpush3.msra.mxu0 %v42_v8 }
  0x1e   :  { %178 = vmatprep.subr.mxu0 %v41_v9 }
  0x1f   :  { %179 = vmatpush3.msra.mxu0 %v41_v9 }
  0x20   :  { %180 = vmatprep.subr.mxu0 %v40_v10 }
  0x21   :  { %181 = vmatpush3.msra.mxu0 %v40_v10 }
  0x22   :  { %182 = vmatprep.subr.mxu0 %v39_v11 }
  0x23   :  { %183 = vmatpush3.msra.mxu0 %v39_v11 }
  0x24   :  { %184 = vmatprep.subr.mxu0 %v38_v12 }
  0x25   :  { %185 = vmatpush3.msra.mxu0 %v38_v12 }
  0x26   :  { %186 = vmatprep.subr.mxu0 %v37_v13 }
  0x27   :  { %187 = vmatpush3.msra.mxu0 %v37_v13 }
  0x28   :  { %188 = vmatprep.subr.mxu0 %v36_v14 }
  0x29   :  { %189 = vmatpush3.msra.mxu0 %v36_v14 }
  0x2a   :  { %190 = vmatprep.subr.mxu0 %v35_v15 }
  0x2b   :  { %191 = vmatpush3.msra.mxu0 %v35_v15 }
  0x2c   :  { %192 = vmatprep.subr.mxu0 %v34_v16 }
  0x2d   :  { %193 = vmatpush3.msra.mxu0 %v34_v16 }
  0x2e   :  { %195 = vmatmul.mubr.f32.vlgmr.msra.gmra.mxu0 %v33_v17 }
  0xee   :  { %v196_v19 = vpop.f32.mrf.mxu0 }
  0xef   :  { %v129_v21 = vadd.f32 %v196_v19, %v143_v18 }
  0xf0   :  { %v123_v22 = vpop.f32.mrf.mxu0 }
  0xf1   :  { %v135_v23 = vmul.f32 %v133_v20, %v129_v21  ;;  %v124_v24 = vadd.f32 %v143_v18, %v123_v22 }
  0xf3   :  { %137 = vst [vmem:[%s275_s4 + $0x8] sm:$0xff] %v135_v23  ;;  %v134_v25 = vmul.f32 %v133_v20, %v124_v24 }
  0xf5   :  { %136 = vst [vmem:[%s275_s4] sm:$0xff] %v134_v25 }
  0xf6   :  { %142 = vsyncpa [#allocation4], 1 }

</bundles_post_ra>
